<compile_context>
chip_gen: v5e
topology: v5e:2x2
jax: 0.10.0
libtpu: 0.0.40
codegen_flags: <defaults>
</compile_context>

<pallas_src>
import functools

import jax
import jax.numpy as jnp
from jax.experimental import pallas as pl
from jax.experimental.pallas import tpu as pltpu


_VMEM_LIMIT = 32 * 1024 * 1024  # explicit budget, safe on v5e/v6e/v7x


def _round_up(x, m):
    return ((x + m - 1) // m) * m


def _pad2d(x, rows, cols):
    r, c = x.shape
    if r == rows and c == cols:
        return x
    return jnp.pad(x, ((0, rows - r), (0, cols - c)))


# --------------------------------------------------------------------------
# Tiled matmul on the MXU with fused bias + optional ReLU epilogue.
# --------------------------------------------------------------------------
def _matmul_kernel(a_ref, b_ref, bias_ref, o_ref, acc_ref, *, apply_relu):
    k = pl.program_id(2)

    @pl.when(k == 0)
    def _():
        acc_ref[...] = jnp.zeros_like(acc_ref)

    acc_ref[...] += jnp.dot(a_ref[...], b_ref[...],
                            preferred_element_type=jnp.float32)

    @pl.when(k == pl.num_programs(2) - 1)
    def _():
        acc = acc_ref[...] + bias_ref[...].astype(jnp.float32)
        if apply_relu:
            acc = jnp.maximum(acc, 0.0)
        o_ref[...] = acc.astype(o_ref.dtype)


def matmul_pallas(a, b, bias=None, relu=False, *, tm=128, tn=128, tk=128):
    """out = a @ b (+ bias) (+ relu). Pads to tile multiples, slices back."""
    M, K = a.shape
    K2, N = b.shape
    assert K == K2
    Mp, Kp, Np = _round_up(M, tm), _round_up(K, tk), _round_up(N, tn)
    a_p = _pad2d(a, Mp, Kp)
    b_p = _pad2d(b, Kp, Np)
    if bias is None:
        bias_p = jnp.zeros((1, Np), jnp.float32)
    else:
        bias_p = _pad2d(bias.reshape(1, N).astype(jnp.float32), 1, Np)

    out = pl.pallas_call(
        functools.partial(_matmul_kernel, apply_relu=relu),
        out_shape=jax.ShapeDtypeStruct((Mp, Np), a.dtype),
        grid_spec=pltpu.PrefetchScalarGridSpec(
            num_scalar_prefetch=0,
            grid=(Mp // tm, Np // tn, Kp // tk),
            in_specs=[
                pl.BlockSpec((tm, tk), lambda i, j, k: (i, k)),
                pl.BlockSpec((tk, tn), lambda i, j, k: (k, j)),
                pl.BlockSpec((1, tn), lambda i, j, k: (0, j)),
            ],
            out_specs=pl.BlockSpec((tm, tn), lambda i, j, k: (i, j)),
            scratch_shapes=[pltpu.VMEM((tm, tn), jnp.float32)],
        ),
        compiler_params=pltpu.CompilerParams(
            dimension_semantics=("parallel", "parallel", "arbitrary"),
            vmem_limit_bytes=_VMEM_LIMIT,
        ),
    )(a_p, b_p, bias_p)
    return out[:M, :N]


# --------------------------------------------------------------------------
# PairNorm: two-pass tiled kernel (stats pass + normalize pass).
# --------------------------------------------------------------------------
def _pn_stats_kernel(x_ref, colsum_ref, sumsq_ref):
    i = pl.program_id(0)

    @pl.when(i == 0)
    def _():
        colsum_ref[...] = jnp.zeros_like(colsum_ref)
        sumsq_ref[...] = jnp.zeros_like(sumsq_ref)

    x = x_ref[...].astype(jnp.float32)
    colsum_ref[...] += jnp.sum(x, axis=0, keepdims=True)
    # broadcast the scalar sum across the lane-dense (1, 128) accumulator
    sumsq_ref[...] += jnp.sum(x * x, keepdims=True)


def _pn_apply_kernel(x_ref, mean_ref, inv_ref, o_ref, *, apply_relu):
    x = x_ref[...].astype(jnp.float32)
    y = (x - mean_ref[...]) * inv_ref[...]
    if apply_relu:
        y = jnp.maximum(y, 0.0)
    o_ref[...] = y.astype(o_ref.dtype)


def pair_norm_pallas(x, apply_relu=False, *, row_tile=512):
    """PairNorm: x -= col_mean; x /= sqrt(1e-6 + mean_row(||x||^2)).

    Optionally fuses the following ReLU. Handles arbitrary N, D by padding
    with zeros (padded rows/cols contribute 0 to both accumulated sums, and
    the true N is used in the scalar epilogue, so the math is exact)."""
    N, D = x.shape
    Dp = _round_up(D, 128)
    if N <= row_tile:
        tm = _round_up(N, 8)
        Np = tm
    else:
        tm = row_tile
        Np = _round_up(N, tm)
    x_p = _pad2d(x, Np, Dp)

    # Pass 1: accumulate col_sum[1, Dp] and sum(x^2) across row tiles.
    col_sum, sumsq = pl.pallas_call(
        _pn_stats_kernel,
        out_shape=(jax.ShapeDtypeStruct((1, Dp), jnp.float32),
                   jax.ShapeDtypeStruct((1, 128), jnp.float32)),
        grid_spec=pltpu.PrefetchScalarGridSpec(
            num_scalar_prefetch=0,
            grid=(Np // tm,),
            in_specs=[pl.BlockSpec((tm, Dp), lambda i: (i, 0))],
            out_specs=(pl.BlockSpec((1, Dp), lambda i: (0, 0)),
                       pl.BlockSpec((1, 128), lambda i: (0, 0))),
        ),
        compiler_params=pltpu.CompilerParams(
            dimension_semantics=("arbitrary",),
            vmem_limit_bytes=_VMEM_LIMIT,
        ),
    )(x_p)

    # Tiny scalar epilogue: sum((x - m)^2) = sum(x^2) - N * ||m||^2.
    n = jnp.float32(N)
    col_mean = col_sum / n                                    # [1, Dp]
    total_sq = sumsq[0, 0] - n * jnp.sum(col_mean * col_mean)
    inv = jax.lax.rsqrt(1e-6 + total_sq / n)                  # rsqrt, no divide
    inv_row = jnp.full((1, Dp), inv, jnp.float32)

    # Pass 2: stream row tiles, (x - mean) * inv (+ fused ReLU).
    out = pl.pallas_call(
        functools.partial(_pn_apply_kernel, apply_relu=apply_relu),
        out_shape=jax.ShapeDtypeStruct((Np, Dp), x.dtype),
        grid_spec=pltpu.PrefetchScalarGridSpec(
            num_scalar_prefetch=0,
            grid=(Np // tm,),
            in_specs=[
                pl.BlockSpec((tm, Dp), lambda i: (i, 0)),
                pl.BlockSpec((1, Dp), lambda i: (0, 0)),
                pl.BlockSpec((1, Dp), lambda i: (0, 0)),
            ],
            out_specs=pl.BlockSpec((tm, Dp), lambda i: (i, 0)),
        ),
        compiler_params=pltpu.CompilerParams(
            dimension_semantics=("parallel",),
            vmem_limit_bytes=_VMEM_LIMIT,
        ),
    )(x_p, col_mean, inv_row)
    return out[:N, :D]


# --------------------------------------------------------------------------
# GCN layer and full forward.
# --------------------------------------------------------------------------
def gcn_conv_pallas(a_hat, x, w, b, relu=False):
    """GCNConv: A_hat @ (X @ W) + b, optionally with fused ReLU."""
    xw = matmul_pallas(x, w)                              # X @ W       (MXU)
    return matmul_pallas(a_hat, xw, bias=b, relu=relu)    # A_hat @ XW + b


def gcn_forward_pallas(x, a_hat, weights, biases, type_norm="pair"):
    h = x
    num_layers = len(weights)
    for i in range(num_layers - 1):
        # TODO(synk): F.dropout skipped (inference / training=False).
        if type_norm == "pair":
            h = gcn_conv_pallas(a_hat, h, weights[i], biases[i], relu=False)
            h = pair_norm_pallas(h, apply_relu=True)       # PairNorm + fused ReLU
        else:
            h = gcn_conv_pallas(a_hat, h, weights[i], biases[i], relu=True)
        # TODO(synk): energy() logging to ./runs/*.txt is host I/O; omitted.
    h = gcn_conv_pallas(a_hat, h, weights[-1], biases[-1], relu=False)
    return h


# --------------------------------------------------------------------------
# Pure-JAX references and demo graph construction.
# --------------------------------------------------------------------------
def pair_norm_ref(x):
    col_mean = x.mean(axis=0)
    xc = x - col_mean
    return xc / jnp.sqrt(1e-6 + (xc ** 2).sum(axis=1).mean())


def gcn_forward_ref(x, a_hat, weights, biases, type_norm="pair"):
    h = x
    for i in range(len(weights) - 1):
        h = a_hat @ (h @ weights[i]) + biases[i]
        if type_norm == "pair":
            h = pair_norm_ref(h)
        h = jnp.maximum(h, 0.0)
    h = a_hat @ (h @ weights[-1]) + biases[-1]
    return h


def build_gcn_adj(edge_index, num_nodes):
    """Dense D^{-1/2} (A + I) D^{-1/2} propagation matrix (GCNConv default)."""
    src, dst = edge_index
    a = jnp.zeros((num_nodes, num_nodes), jnp.float32)
    a = a.at[src, dst].set(1.0)
    a = a.at[dst, src].set(1.0)
    eye = jnp.eye(num_nodes, dtype=jnp.float32)
    a = jnp.where(eye > 0, 1.0, a)           # self loops
    deg = a.sum(axis=1)
    d_inv_sqrt = jax.lax.rsqrt(deg)
    return a * d_inv_sqrt[:, None] * d_inv_sqrt[None, :]


if __name__ == "__main__":
    key = jax.random.PRNGKey(0)
    num_nodes, num_feats, dim_hidden, num_classes = 200, 96, 64, 7
    num_layers, num_edges = 3, 600

    k_x, k_e, k_w = jax.random.split(key, 3)
    x = jax.random.normal(k_x, (num_nodes, num_feats), jnp.float32)
    edge_index = jax.random.randint(k_e, (2, num_edges), 0, num_nodes)
    a_hat = build_gcn_adj(edge_index, num_nodes)

    dims = [num_feats] + [dim_hidden] * (num_layers - 1) + [num_classes]
    wkeys = jax.random.split(k_w, num_layers)
    weights, biases = [], []
    for i in range(num_layers):
        fan_in, fan_out = dims[i], dims[i + 1]
        w = jax.random.normal(wkeys[i], (fan_in, fan_out), jnp.float32)
        weights.append(w / jnp.sqrt(jnp.float32(fan_in)))
        biases.append(jnp.full((fan_out,), 0.01 * (i + 1), jnp.float32))

    out = gcn_forward_pallas(x, a_hat, weights, biases, type_norm="pair")
    out = jax.block_until_ready(out)

    ref = gcn_forward_ref(x, a_hat, weights, biases, type_norm="pair")
    assert out.shape == (num_nodes, num_classes)
    max_err = jnp.max(jnp.abs(out - ref))
    assert jnp.allclose(out, ref, atol=1e-2, rtol=1e-2), (
        f"mismatch vs reference, max|err|={max_err}")

    print("KERNEL_OK")
</pallas_src>

<mosaic_0001>
module attributes {stable_mosaic.version = 11 : i64} {
  func.func @_matmul_kernel(%arg0: i32, %arg1: i32, %arg2: i32, %arg3: memref<128x128xf32, #tpu.memory_space<vmem>>, %arg4: memref<128x128xf32, #tpu.memory_space<vmem>>, %arg5: memref<1x128xf32, #tpu.memory_space<vmem>>, %arg6: memref<128x128xf32, #tpu.memory_space<vmem>>, %arg7: memref<128x128xf32, #tpu.memory_space<vmem>>) attributes {dimension_semantics = [#tpu.dimension_semantics<parallel>, #tpu.dimension_semantics<parallel>, #tpu.dimension_semantics<arbitrary>], iteration_bounds = array<i64: 2, 1, 1>, scalar_prefetch = 0 : i64, scratch_operands = 1 : i64, tpu.core_type = #tpu.core_type<tc>, window_params = [{transform_indices = @transform_0, window_bounds = array<i64: 128, 128>}, {transform_indices = @transform_1, window_bounds = array<i64: 128, 128>}, {transform_indices = @transform_2, window_bounds = array<i64: 1, 128>}, {transform_indices = @transform_3, window_bounds = array<i64: 128, 128>}]} {
    %c0_i32 = arith.constant 0 : i32
    %0 = arith.cmpi eq, %arg2, %c0_i32 : i32
    %1 = arith.extui %0 : i1 to i32
    %c0_i32_0 = arith.constant 0 : i32
    %2 = arith.cmpi ne, %1, %c0_i32_0 : i32
    scf.if %2 {
      %cst_10 = arith.constant 0.000000e+00 : f32
      %12 = vector.broadcast %cst_10 : f32 to vector<128x128xf32>
      %c0_11 = arith.constant 0 : index
      %c0_12 = arith.constant 0 : index
      %13 = vector.load %arg7[%c0_11, %c0_12] : memref<128x128xf32, #tpu.memory_space<vmem>>, vector<128x128xf32>
      tpu.vector_store %arg7[%c0_11, %c0_12], %12 {strides = array<i32>} : memref<128x128xf32, #tpu.memory_space<vmem>>, vector<128x128xf32>,
    } else {
    }
    %c0 = arith.constant 0 : index
    %c0_1 = arith.constant 0 : index
    %3 = vector.load %arg7[%c0, %c0_1] : memref<128x128xf32, #tpu.memory_space<vmem>>, vector<128x128xf32>
    %c0_2 = arith.constant 0 : index
    %c0_3 = arith.constant 0 : index
    %4 = vector.load %arg3[%c0_2, %c0_3] : memref<128x128xf32, #tpu.memory_space<vmem>>, vector<128x128xf32>
    %c0_4 = arith.constant 0 : index
    %c0_5 = arith.constant 0 : index
    %5 = vector.load %arg4[%c0_4, %c0_5] : memref<128x128xf32, #tpu.memory_space<vmem>>, vector<128x128xf32>
    %cst = arith.constant dense<0.000000e+00> : vector<128x128xf32>
    %6 = tpu.matmul %4, %5, %cst {dimension_numbers = #tpu.dot_dimension_numbers<[1], [0], [0], [1], [0, 0, 1, 1], [], []>} : vector<128x128xf32>, vector<128x128xf32>, vector<128x128xf32> -> vector<128x128xf32>
    %7 = arith.addf %3, %6 : vector<128x128xf32>
    %c0_6 = arith.constant 0 : index
    %c0_7 = arith.constant 0 : index
    %8 = vector.load %arg7[%c0_6, %c0_7] : memref<128x128xf32, #tpu.memory_space<vmem>>, vector<128x128xf32>
    tpu.vector_store %arg7[%c0_6, %c0_7], %7 {strides = array<i32>} : memref<128x128xf32, #tpu.memory_space<vmem>>, vector<128x128xf32>,
    %c0_i32_8 = arith.constant 0 : i32
    %9 = arith.cmpi eq, %arg2, %c0_i32_8 : i32
    %10 = arith.extui %9 : i1 to i32
    %c0_i32_9 = arith.constant 0 : i32
    %11 = arith.cmpi ne, %10, %c0_i32_9 : i32
    scf.if %11 {
      %c0_10 = arith.constant 0 : index
      %c0_11 = arith.constant 0 : index
      %12 = vector.load %arg7[%c0_10, %c0_11] : memref<128x128xf32, #tpu.memory_space<vmem>>, vector<128x128xf32>
      %c0_12 = arith.constant 0 : index
      %c0_13 = arith.constant 0 : index
      %13 = vector.load %arg5[%c0_12, %c0_13] : memref<1x128xf32, #tpu.memory_space<vmem>>, vector<1x128xf32>
      %14 = vector.broadcast %13 : vector<1x128xf32> to vector<128x128xf32>
      %15 = arith.addf %12, %14 : vector<128x128xf32>
      %c0_14 = arith.constant 0 : index
      %c0_15 = arith.constant 0 : index
      %16 = vector.load %arg6[%c0_14, %c0_15] : memref<128x128xf32, #tpu.memory_space<vmem>>, vector<128x128xf32>
      tpu.vector_store %arg6[%c0_14, %c0_15], %15 {strides = array<i32>} : memref<128x128xf32, #tpu.memory_space<vmem>>, vector<128x128xf32>,
    } else {
    }
    return
  }
  func.func @transform_0(%arg0: i32, %arg1: i32, %arg2: i32) -> (i32, i32) {
    %c0_i32 = arith.constant 0 : i32
    return %arg0, %arg2 : i32, i32
  }
  func.func @transform_1(%arg0: i32, %arg1: i32, %arg2: i32) -> (i32, i32) {
    %c0_i32 = arith.constant 0 : i32
    return %arg2, %arg1 : i32, i32
  }
  func.func @transform_2(%arg0: i32, %arg1: i32, %arg2: i32) -> (i32, i32) {
    %c0_i32 = arith.constant 0 : i32
    %c0_i32_0 = arith.constant 0 : i32
    return %c0_i32, %arg1 : i32, i32
  }
  func.func @transform_3(%arg0: i32, %arg1: i32, %arg2: i32) -> (i32, i32) {
    %c0_i32 = arith.constant 0 : i32
    return %arg0, %arg1 : i32, i32
  }
}

</mosaic_0001>

<bundles_post_ra>
// kernel: tpu_custom_call.1
= control target key start
LH: loop header
LB: loop body
LE: loop exit
PB: predicated region body
PF: predicated region fallthrough
CT: control target
= control target key end

     0   :  { %s1129_s0 = inlined_call_operand.hbm [shape: f32[256,128], index: 0, kind: input, shape index: {}]   ;;  %s1130_s1 = inlined_call_operand.hbm [shape: f32[128,128], index: 1, kind: input, shape index: {}]   ;;  %s1131_s2 = inlined_call_operand.vmem [shape: f32[1,128], index: 2, kind: input, shape index: {}]   ;;  %s1132_s3 = inlined_call_operand.hbm [shape: f32[256,128], index: 3, kind: output, shape index: {}]  }
   0x1   :  { %1134 = sst [smem:[#allocation12_spill]] %s1130_s1 }
   0x2   :  { %8 = vsyncpa [#allocation4], 0 }
   0x3   :  { %10 = vsyncpa [#allocation4 + $0x1], 0 }
   0x4   :  { %11 = vsyncpa [#allocation7], 0 }
   0x5   :  { %12 = vsyncpa [#allocation5], 0 }
   0x6   :  { %14 = vsyncpa [#allocation5 + $0x1], 0  ;;  %s930_s12 = smov 0   ;;  %s932_s13 = smov 0  }
   0x7   :  { %s934_s14 = smov 0   ;;  %s936_s15 = smov 0  }
   0x8   :  { %s938_s16 = smov 0   ;;  %s940_s17 = smov 0  }
   0x9 LB: > { %s611_s18 = sadd.s32 4294967295, %s903_s17   ;;  %s612_s19 = sadd.s32 4294967294, %s903_s17   ;;  %s903_s17 = sphi %s940_s17, %s20_s17   ;;  %s899_s16 = sphi %s938_s16, %s1148_s16   ;;  %s895_s15 = sphi %s936_s15, %s1147_s15   ;;  %s891_s14 = sphi %s934_s14, %s1146_s14   ;;  %s887_s13 = sphi %s932_s13, %s1145_s13   ;;  %s883_s12 = sphi %s930_s12, %s1144_s12  }
   0xa   : > { %p61_p0 = scmp.ne.s32.totalorder %s887_s13, %s883_s12  ;;  %p964_p1 = scmp.eq.s32.totalorder %s611_s18, 0 }
   0xb   : > { %p968_p2 = scmp.eq.s32.totalorder %s611_s18, 1  ;;  %p147_p3 = scmp.eq.s32.totalorder %s612_s19, 1 }
   0xc   : > { %p974_p4 = por %p964_p1, %p61_p0  ;;  %p613_p5 = scmp.ge.s32.totalorder %s903_s17, 1 }
   0xd   : > { %p979_p6 = por %p147_p3, %p61_p0  ;;  %p154_p7 = scmp.lt.s32.totalorder %s903_s17, 3 }
   0xe   : > { %s1139_s1 = sld [smem:[#allocation12_spill]]  ;;  %s905_s28 = smov [#allocation6]  }
   0xf   : > { %p987_p8 = pnand %p613_p5, %p154_p7  ;;  %s171_s29 = sshll.u32 %s905_s28, 4  ;;  %s172_s29 = int_to_ptr.vmem [resolvable:$true] %s171_s29 }
  0x10   : > { %p616_p11 = scmp.ge.s32.totalorder %s903_s17, 2  ;;  %s1133_s30 = smov 128  }
  0x11   : > { %p687_p9 = pneg %p987_p8  ;;  %s907_s4 = smov 8  }
  0x12   : > { %s39_s5 = sadd.s32 1, %s899_s16  ;;  %s48_s6 = sadd.s32 1, %s891_s14 }
  0x13   : > { %p688_p10 = pnand %p687_p9, %p964_p1  ;;  %p41_p12 = scmp.ge.s32.totalorder %s39_s5, 2 }
  0x14   : > { %s169_s26 = sshll.u32 %s1139_s1, 4  ;;  %p55_p13 = scmp.ne.s32.totalorder %s891_s14, %s887_s13  ;;  %s170_s26 = int_to_ptr.hbm [resolvable:$true] %s169_s26 }
  0x15   : > { %690 = dma.hbm_to_vmem [thread:$0]  (!%p688_p10), %s170_s26, 2048, %s172_s29, [#allocation7], %s1133_s30, %s1133_s30, %s907_s4  }
  0x16   : > { %p56_p0 = scmp.eq.s32.totalorder %s903_s17, 0  ;;  %s1150_s5 = smov (%p41_p12, %s39_s5), 0 }
  0x17   : > { %p1012_p5 = por %p968_p2, %p55_p13  ;;  %s43_s9 = ssub.s32 %s899_s16, %s1150_s5 }
  0x18   : > { %p1006_p3 = por %p56_p0, %p55_p13  ;;  %p700_p7 = scmp.lt.s32.totalorder %s903_s17, 2 }
  0x19   : > { %p46_p9 = scmp.eq.s32.totalorder %s43_s9, 0  ;;  %s191_s10 = sand.u32 1, %s891_s14  }
  0x1a   : > { %s617_s11 = sshll.u32 %s191_s10, 7  ;;  %s629_s19 = sshll.u32 %s899_s16, 7 }
  0x1b   : > { %s1021_s18 = scalar_select %p46_p9, %s891_s14, %s48_s6  }
  0x1c   : > { %s201_s26 = scalar_lea.hbm %s1129_s0, %s629_s19  ;;  %s195_s28 = scalar_lea.vmem [#allocation3], %s617_s11 }
  0x1d   : > { %s204_s29 = sshll.u32 %s195_s28, 4  ;;  %s202_s21 = sshll.u32 %s201_s26, 4  ;;  %s205_s29 = int_to_ptr.vmem [resolvable:$true] %s204_s29  ;;  %s203_s21 = int_to_ptr.hbm [resolvable:$true] %s202_s21 }
  0x1e   : > { %p692_p2 = pnand %p700_p7, %p1006_p3  ;;  %s192_s30 = scalar_lea.sflag [#allocation4], %s191_s10 }
  0x1f   : > { %s1143_s1 = smov 128   ;;  %216 = sbr.rel (%p987_p8) target bundleno = 234 (0xea), region = 32 }
  0x20   : > { %694 = dma.hbm_to_vmem [thread:$0]  (!%p692_p2), %s203_s21, 2048, %s205_s29, %s192_s30, %s1143_s1, %s1143_s1, %s907_s4  }
  0x21   : > { %s1035_s6 = sand.u32 (!%p987_p8), 1, %s887_s13  }
  0x22   : > { %s621_s9 = sshll.u32 (!%p987_p8), %s1035_s6, 7  ;;  %s219_s11 = scalar_lea.sflag (!%p987_p8), [#allocation4], %s1035_s6 }
  0x23   : > { %s1041_s7 = scalar_lea.vmem (!%p987_p8), [#allocation3], %s621_s9 }
  0x24   : > { %870 = dma.done.wait (%p974_p4), %s219_s11, 2048  }
  0x25   : > { %872 = vsyncadd (%p974_p4), %s219_s11, 4294965248 }
  0x26   : > { %874 = dma.done.wait (%p964_p1), [#allocation7], 2048  }
  0x27   : > { %876 = vsyncadd (%p964_p1), [#allocation7], 4294965248  ;;  %v327_v0 = vld [vmem:[#allocation6 + $0x78] sm:$0xff]  ;;  %v326_v1 = vld [vmem:[#allocation6 + $0x70] sm:$0xff]  ;;  %s1072_s22 = scalar_lea.vmem [#allocation8], %s621_s9  ;;  %s630_s27 = sshll.u32 %s895_s15, 7 }
  0x28   : > { %632 = vmatpush.msra.mxu2 %v327_v0  ;;  %633 = vmatpush.msra.mxu3 %v327_v0  ;;  %v325_v2 = vld [vmem:[#allocation6 + $0x68] sm:$0xff]  ;;  %v324_v3 = vld [vmem:[#allocation6 + $0x60] sm:$0xff]  ;;  %v323_v4 = vld [vmem:[#allocation6 + $0x58] sm:$0xff]  ;;  %s493_s10 = scalar_lea.hbm %s1132_s3, %s630_s27  ;;  %s494_s19 = sshll.u32 %s1072_s22, 4  ;;  %s495_s19 = int_to_ptr.vmem [resolvable:$true] %s494_s19 }
  0x29   : > { %328 = vmatpush.msra.mxu0 %v327_v0  ;;  %631 = vmatpush.msra.mxu1 %v327_v0  ;;  %v322_v5 = vld [vmem:[#allocation6 + $0x50] sm:$0xff]  ;;  %v321_v6 = vld [vmem:[#allocation6 + $0x48] sm:$0xff]  ;;  %v320_v7 = vld [vmem:[#allocation6 + $0x40] sm:$0xff]  ;;  %s496_s24 = sshll.u32 %s493_s10, 4  ;;  %s481_s15 = scalar_lea.sflag [#allocation5], %s1035_s6  ;;  %s497_s24 = int_to_ptr.hbm [resolvable:$true] %s496_s24 }
  0x2a   : > { %635 = vmatpush.msra.mxu2 %v326_v1  ;;  %636 = vmatpush.msra.mxu3 %v326_v1  ;;  %v319_v8 = vld [vmem:[#allocation6 + $0x38] sm:$0xff]  ;;  %v318_v9 = vld [vmem:[#allocation6 + $0x30] sm:$0xff]  ;;  %v317_v10 = vld [vmem:[#allocation6 + $0x28] sm:$0xff]  ;;  %s831_s25 = sshra.s32 %s497_s24, 4  ;;  %s837_s21 = scalar_lea.hbm %s1132_s3, 256  ;;  %s832_s25 = int_to_ptr.hbm [resolvable:$true] %s831_s25 }
  0x2b   : > { %329 = vmatpush.msra.mxu0 %v326_v1  ;;  %634 = vmatpush.msra.mxu1 %v326_v1  ;;  %v316_v11 = vld [vmem:[#allocation6 + $0x20] sm:$0xff]  ;;  %v315_v12 = vld [vmem:[#allocation6 + $0x18] sm:$0xff]  ;;  %v314_v13 = vld [vmem:[#allocation6 + $0x10] sm:$0xff]  ;;  %s833_s26 = scalar_lea.hbm %s832_s25, 128  ;;  %p838_p10 = scmp.lt.s32.totalorder %s832_s25, %s1132_s3 }
  0x2c   : > { %638 = vmatpush.msra.mxu2 %v325_v2  ;;  %639 = vmatpush.msra.mxu3 %v325_v2  ;;  %v313_v14 = vld [vmem:[#allocation6 + $0x8] sm:$0xff]  ;;  %v312_v15 = vld [vmem:[#allocation6] sm:$0xff]  ;;  %v306_v24 = vld [vmem:[%s1041_s7 + $0x50] sm:$0xff]  ;;  %p834_p1 = scmp.ne.s32.totalorder %s832_s25, %s833_s26  ;;  %p839_p12 = scmp.lt.s32.totalorder %s837_s21, %s833_s26 }
  0x2d   : > { %330 = vmatpush.msra.mxu0 %v325_v2  ;;  %637 = vmatpush.msra.mxu1 %v325_v2  ;;  %v304_v16 = vld [vmem:[%s1041_s7 + $0x40] sm:$0xff]  ;;  %v305_v20 = vld [vmem:[%s1041_s7 + $0x48] sm:$0xff]  ;;  %v310_v25 = vld [vmem:[%s1041_s7 + $0x70] sm:$0xff] }
  0x2e   : > { %641 = vmatpush.msra.mxu2 %v324_v3  ;;  %642 = vmatpush.msra.mxu3 %v324_v3  ;;  %v308_v17 = vld [vmem:[%s1041_s7 + $0x60] sm:$0xff]  ;;  %v309_v21 = vld [vmem:[%s1041_s7 + $0x68] sm:$0xff]  ;;  %v298_v26 = vld [vmem:[%s1041_s7 + $0x10] sm:$0xff]  ;;  %p835_p4 = pnand %p834_p1, %p1012_p5  ;;  %p840_p13 = por %p839_p12, %p838_p10 }
  0x2f   : > { %331 = vmatpush.msra.mxu0 %v324_v3  ;;  %640 = vmatpush.msra.mxu1 %v324_v3  ;;  %v296_v18 = vld [vmem:[%s1041_s7] sm:$0xff]  ;;  %v297_v22 = vld [vmem:[%s1041_s7 + $0x8] sm:$0xff]  ;;  %v302_v27 = vld [vmem:[%s1041_s7 + $0x30] sm:$0xff] }
  0x30   : > { %644 = vmatpush.msra.mxu2 %v323_v4  ;;  %645 = vmatpush.msra.mxu3 %v323_v4  ;;  %v300_v19 = vld [vmem:[%s1041_s7 + $0x20] sm:$0xff]  ;;  %v301_v23 = vld [vmem:[%s1041_s7 + $0x28] sm:$0xff]  ;;  %v307_v28 = vld [vmem:[%s1041_s7 + $0x58] sm:$0xff]  ;;  %p836_p8 = pneg %p835_p4 }
  0x31   : > { %332 = vmatpush.msra.mxu0 %v323_v4  ;;  %643 = vmatpush.msra.mxu1 %v323_v4  ;;  %v311_v29 = vld [vmem:[%s1041_s7 + $0x78] sm:$0xff]  ;;  %v756_v32 = vld [vmem:[%s1131_s2] ss:$0 sm:$0xff] }
  0x32   : > { %647 = vmatpush.msra.mxu2 %v322_v5  ;;  %648 = vmatpush.msra.mxu3 %v322_v5  ;;  %v299_v30 = vld [vmem:[%s1041_s7 + $0x18] sm:$0xff]  ;;  %p841_p0 = pnand %p840_p13, %p836_p8 }
  0x33   : > { %333 = vmatpush.msra.mxu0 %v322_v5  ;;  %646 = vmatpush.msra.mxu1 %v322_v5  ;;  %v303_v31 = vld [vmem:[%s1041_s7 + $0x38] sm:$0xff] }
  0x34   : > { %650 = vmatpush.msra.mxu2 %v321_v6  ;;  %651 = vmatpush.msra.mxu3 %v321_v6 }
  0x35   : > { %334 = vmatpush.msra.mxu0 %v321_v6  ;;  %649 = vmatpush.msra.mxu1 %v321_v6 }
  0x36   : > { %653 = vmatpush.msra.mxu2 %v320_v7  ;;  %654 = vmatpush.msra.mxu3 %v320_v7 }
  0x37   : > { %335 = vmatpush.msra.mxu0 %v320_v7  ;;  %652 = vmatpush.msra.mxu1 %v320_v7 }
  0x38   : > { %656 = vmatpush.msra.mxu2 %v319_v8  ;;  %657 = vmatpush.msra.mxu3 %v319_v8 }
  0x39   : > { %336 = vmatpush.msra.mxu0 %v319_v8  ;;  %655 = vmatpush.msra.mxu1 %v319_v8 }
  0x3a   : > { %659 = vmatpush.msra.mxu2 %v318_v9  ;;  %660 = vmatpush.msra.mxu3 %v318_v9 }
  0x3b   : > { %337 = vmatpush.msra.mxu0 %v318_v9  ;;  %658 = vmatpush.msra.mxu1 %v318_v9 }
  0x3c   : > { %662 = vmatpush.msra.mxu2 %v317_v10  ;;  %663 = vmatpush.msra.mxu3 %v317_v10 }
  0x3d   : > { %338 = vmatpush.msra.mxu0 %v317_v10  ;;  %661 = vmatpush.msra.mxu1 %v317_v10 }
  0x3e   : > { %665 = vmatpush.msra.mxu2 %v316_v11  ;;  %666 = vmatpush.msra.mxu3 %v316_v11 }
  0x3f   : > { %339 = vmatpush.msra.mxu0 %v316_v11  ;;  %664 = vmatpush.msra.mxu1 %v316_v11 }
  0x40   : > { %668 = vmatpush.msra.mxu2 %v315_v12  ;;  %669 = vmatpush.msra.mxu3 %v315_v12 }
  0x41   : > { %340 = vmatpush.msra.mxu0 %v315_v12  ;;  %667 = vmatpush.msra.mxu1 %v315_v12 }
  0x42   : > { %671 = vmatpush.msra.mxu2 %v314_v13  ;;  %672 = vmatpush.msra.mxu3 %v314_v13 }
  0x43   : > { %341 = vmatpush.msra.mxu0 %v314_v13  ;;  %670 = vmatpush.msra.mxu1 %v314_v13 }
  0x44   : > { %674 = vmatpush.msra.mxu2 %v313_v14  ;;  %675 = vmatpush.msra.mxu3 %v313_v14 }
  0x45   : > { %342 = vmatpush.msra.mxu0 %v313_v14  ;;  %673 = vmatpush.msra.mxu1 %v313_v14 }
  0x46   : > { %677 = vmatpush.msra.mxu2 %v312_v15  ;;  %678 = vmatpush.msra.mxu3 %v312_v15 }
  0x47   : > { %368 = vmatmul.f32.vlgmr.msra.gmra.mxu2 %v304_v16  ;;  %380 = vmatmul.f32.vlgmr.msra.gmra.mxu3 %v308_v17 }
  0x48   : > { %343 = vmatpush.msra.mxu0 %v312_v15  ;;  %676 = vmatpush.msra.mxu1 %v312_v15 }
  0x49   : > { %344 = vmatmul.f32.vlgmr.msra.gmra.mxu0 %v296_v18  ;;  %356 = vmatmul.f32.vlgmr.msra.gmra.mxu1 %v300_v19 }
  0x4f   : > { %371 = vmatmul.f32.gmra.mxu2 %v305_v20  ;;  %383 = vmatmul.f32.gmra.mxu3 %v309_v21 }
  0x51   : > { %347 = vmatmul.f32.gmra.mxu0 %v297_v22  ;;  %359 = vmatmul.f32.gmra.mxu1 %v301_v23 }
  0x57   : > { %374 = vmatmul.f32.gmra.mxu2 %v306_v24  ;;  %386 = vmatmul.f32.gmra.mxu3 %v310_v25 }
  0x59   : > { %350 = vmatmul.f32.gmra.mxu0 %v298_v26  ;;  %362 = vmatmul.f32.gmra.mxu1 %v302_v27 }
  0x5f   : > { %377 = vmatmul.f32.gmra.mxu2 %v307_v28  ;;  %389 = vmatmul.f32.gmra.mxu3 %v311_v29 }
  0x61   : > { %353 = vmatmul.f32.gmra.mxu0 %v299_v30  ;;  %365 = vmatmul.f32.gmra.mxu1 %v303_v31 }
  0xc6   : > { %v345_v33 = vpop.f32.mrf.mxu0  ;;  %v357_v34 = vpop.f32.mrf.mxu1 }
  0xc7   : > { %v448_v35 = vadd.f32 %v756_v32, %v345_v33  ;;  %v452_v36 = vadd.f32 %v756_v32, %v357_v34 }
  0xc9   : > { %464 = vst [vmem:[%s1072_s22] sm:$0xff] %v448_v35 }
  0xca   : > { %468 = vst [vmem:[%s1072_s22 + $0x20] sm:$0xff] %v452_v36  ;;  %v369_v37 = vpop.f32.mrf.mxu2  ;;  %v381_v38 = vpop.f32.mrf.mxu3 }
  0xcb   : > { %v456_v39 = vadd.f32 %v756_v32, %v369_v37  ;;  %v460_v40 = vadd.f32 %v756_v32, %v381_v38 }
  0xcd   : > { %472 = vst [vmem:[%s1072_s22 + $0x40] sm:$0xff] %v456_v39 }
  0xce   : > { %476 = vst [vmem:[%s1072_s22 + $0x60] sm:$0xff] %v460_v40  ;;  %v348_v41 = vpop.f32.mrf.mxu0  ;;  %v360_v42 = vpop.f32.mrf.mxu1 }
  0xcf   : > { %v449_v43 = vadd.f32 %v756_v32, %v348_v41  ;;  %v453_v44 = vadd.f32 %v756_v32, %v360_v42 }
  0xd1   : > { %465 = vst [vmem:[%s1072_s22 + $0x8] sm:$0xff] %v449_v43 }
  0xd2   : > { %469 = vst [vmem:[%s1072_s22 + $0x28] sm:$0xff] %v453_v44  ;;  %v372_v45 = vpop.f32.mrf.mxu2  ;;  %v384_v46 = vpop.f32.mrf.mxu3 }
  0xd3   : > { %v457_v47 = vadd.f32 %v756_v32, %v372_v45  ;;  %v461_v48 = vadd.f32 %v756_v32, %v384_v46 }
  0xd5   : > { %473 = vst [vmem:[%s1072_s22 + $0x48] sm:$0xff] %v457_v47 }
  0xd6   : > { %477 = vst [vmem:[%s1072_s22 + $0x68] sm:$0xff] %v461_v48  ;;  %v351_v49 = vpop.f32.mrf.mxu0  ;;  %v363_v50 = vpop.f32.mrf.mxu1 }
  0xd7   : > { %v450_v51 = vadd.f32 %v756_v32, %v351_v49  ;;  %v454_v52 = vadd.f32 %v756_v32, %v363_v50 }
  0xd9   : > { %466 = vst [vmem:[%s1072_s22 + $0x10] sm:$0xff] %v450_v51 }
  0xda   : > { %470 = vst [vmem:[%s1072_s22 + $0x30] sm:$0xff] %v454_v52  ;;  %v375_v53 = vpop.f32.mrf.mxu2  ;;  %v387_v54 = vpop.f32.mrf.mxu3 }
  0xdb   : > { %v458_v55 = vadd.f32 %v756_v32, %v375_v53  ;;  %v462_v56 = vadd.f32 %v756_v32, %v387_v54 }
  0xdd   : > { %474 = vst [vmem:[%s1072_s22 + $0x50] sm:$0xff] %v458_v55 }
  0xde   : > { %478 = vst [vmem:[%s1072_s22 + $0x70] sm:$0xff] %v462_v56  ;;  %v354_v57 = vpop.f32.mrf.mxu0  ;;  %v366_v58 = vpop.f32.mrf.mxu1 }
  0xdf   : > { %v451_v59 = vadd.f32 %v756_v32, %v354_v57  ;;  %v455_v60 = vadd.f32 %v756_v32, %v366_v58 }
  0xe1   : > { %467 = vst [vmem:[%s1072_s22 + $0x18] sm:$0xff] %v451_v59 }
  0xe2   : > { %471 = vst [vmem:[%s1072_s22 + $0x38] sm:$0xff] %v455_v60  ;;  %v378_v61 = vpop.f32.mrf.mxu2  ;;  %v390_v62 = vpop.f32.mrf.mxu3 }
  0xe3   : > { %v459_v63 = vadd.f32 %v756_v32, %v378_v61  ;;  %v463_v0 = vadd.f32 %v756_v32, %v390_v62 }
  0xe5   : > { %475 = vst [vmem:[%s1072_s22 + $0x58] sm:$0xff] %v459_v63 }
  0xe6   : > { %479 = vst [vmem:[%s1072_s22 + $0x78] sm:$0xff] %v463_v0 }
  0xe7   : > { %844 = shalt.err (!%p841_p0)
}
  0xe8   : > { %s908_s6 = smov 128   ;;  %s909_s7 = smov 8  }
  0xe9   : > { %685 = dma.vmem_to_hbm [thread:$0]  (%p1012_p5), %s495_s19, 2048, %s497_s24, %s481_s15, %s908_s6, %s908_s6, %s909_s7  }
  0xea PF: > { %s511_s1 = sand.u32 1, %s883_s12   ;;  %p696_p3 = pnand %p616_p11, %p979_p6 }
  0xeb   : > { %s512_s20 = scalar_lea.sflag [#allocation5], %s511_s1 }
  0xec   : > { %p697_p7 = pneg %p696_p3 }
  0xee   : > { %878 = dma.done.wait (%p697_p7), %s512_s20, 2048  }
  0xef   : > { %880 = vsyncadd (%p697_p7), %s512_s20, 4294965248  ;;  %s20_s17 = sadd.s32 1, %s903_s17   ;;  %s1144_s12 = smov %s887_s13 }
  0xf0   : > { %p17_p9 = scmp.ge.s32.totalorder %s20_s17, 4   ;;  %s1145_s13 = smov %s891_s14 }
  0xf1   : > { %s1146_s14 = smov %s1021_s18  ;;  %s1147_s15 = smov %s899_s16 }
  0xf2   : > { %s1148_s16 = smov %s1150_s5  ;;  %19 = sbr.rel (!%p17_p9) target bundleno = 9 (0x9), region = 93 }
  0xf7   :  { %518 = vsyncpa [#allocation4], 1 }
  0xf8   :  { %520 = vsyncpa [#allocation4 + $0x1], 1 }
  0xf9   :  { %521 = vsyncpa [#allocation7], 1 }
  0xfa   :  { %522 = vsyncpa [#allocation5], 1 }
  0xfb   :  { %524 = vsyncpa [#allocation5 + $0x1], 1 }

</bundles_post_ra>
